<compile_context>
chip_gen: v7x
topology: tpu7x:2x2x1
jax: 0.10.0
libtpu: 0.0.40
codegen_flags: <defaults>
</compile_context>

<pallas_src>
import jax
import jax.numpy as jnp
from jax.experimental import pallas as pl
from jax.experimental.pallas import tpu as pltpu

HD = 4
GRID_COUNT = 5
INIT_SCALE = 0.01
HID_BRANCH = 5
HID_TRUNK = 5
NUM_LAYER_BRANCH = 1
NUM_LAYER_TRUNK = 1


def define_kan_width(input_dim, W, repeat_hid, output_dim):
    return [input_dim] + [W] * repeat_hid + [output_dim]


# ---------------------------------------------------------------------------
# Fused Pallas kernel: branch RBFKAN -> trunk RBFKAN -> combine
# ---------------------------------------------------------------------------
def _make_deeponet_kernel(n_branch_layers, n_trunk_layers, grid_count, hd):
    """Build the fused kernel for a fixed number of branch/trunk layers."""

    def grid_params(x):
        # RBF grid is derived from the net's input range (same grid for every
        # layer of that net, matching the reference where min/max are fixed
        # buffers).  Two-stage keepdims reductions -> (1, 1) scalars.
        lo = jnp.min(jnp.min(x, axis=-1, keepdims=True), axis=0, keepdims=True)
        hi = jnp.max(jnp.max(x, axis=-1, keepdims=True), axis=0, keepdims=True)
        span = jnp.maximum(hi - lo, jnp.float32(1e-6))      # guard max == min
        h = span / jnp.float32(grid_count - 1)
        inv_h = 1.0 / h
        return lo, h, inv_h

    def rbf_features(x, lo, h, inv_h):
        # phi[:, g*Din + i] = exp(-((x[:, i] - c_g) / h)^2)
        feats = []
        for g in range(grid_count):          # static, unrolled (G = 5)
            c = lo + jnp.float32(g) * h
            feats.append(jnp.exp(-jnp.square((x - c) * inv_h)))   # VPU + EUP
        return jnp.concatenate(feats, axis=-1)                    # (rows, G*Din)

    def kernel(xb_ref, xt_ref, *rest):
        wb_refs = rest[:n_branch_layers]
        wt_refs = rest[n_branch_layers:n_branch_layers + n_trunk_layers]
        y_ref = rest[n_branch_layers + n_trunk_layers]

        # ---- branch net: each layer = one MXU matmul with K = G*Din
        a = xb_ref[...]
        lo, h, inv_h = grid_params(a)
        for w_ref in wb_refs:
            a = jnp.dot(rbf_features(a, lo, h, inv_h), w_ref[...],
                        preferred_element_type=jnp.float32)
        yb = a                               # (B, HD*I), columns ordered k*I + i

        # ---- trunk net
        a = xt_ref[...]
        lo, h, inv_h = grid_params(a)
        for w_ref in wt_refs:
            a = jnp.dot(rbf_features(a, lo, h, inv_h), w_ref[...],
                        preferred_element_type=jnp.float32)
        yt = a                               # (N, HD)

        # ---- combine: Y[b, n, i] = sum_k y_branch[b, i, k] * y_trunk[n, k]
        B = yb.shape[0]
        N = yt.shape[0]
        I = yb.shape[1] // hd
        acc = None
        for k in range(hd):                  # static, unrolled (HD = 4)
            yb_k = yb[:, k * I:(k + 1) * I]  # (B, I)  static lane slice
            yt_k = yt[:, k:k + 1]            # (N, 1)  static lane slice
            term = yt_k[None, :, :] * yb_k[:, None, :]   # (B, N, I)
            acc = term if acc is None else acc + term
        y_ref[...] = acc.astype(y_ref.dtype)

    return kernel


# ---------------------------------------------------------------------------
# Parameter init & wrapper
# ---------------------------------------------------------------------------
def init_rbfkan_params(key, widths):
    """Per-layer spline weights, stored as (grid_count, Din, Dout)."""
    params = []
    for i in range(len(widths) - 1):
        key, sub = jax.random.split(key)
        w = INIT_SCALE * jax.random.normal(
            sub, (GRID_COUNT, widths[i], widths[i + 1]), dtype=jnp.float32)
        params.append(w)
    return params


def _flatten_weight(w):
    # (G, Din, Dout) -> (G*Din, Dout); row index g*Din + i matches the
    # in-kernel concatenation order of the RBF features.
    g, din, dout = w.shape
    return w.reshape(g * din, dout)


def _to_k_major(w_flat, hd):
    # Reference: y_branch.view(-1, I, HD) maps output column j -> (i, k) with
    # j = i*HD + k.  Permute columns to k-major (k*I + i) so the combine can
    # use cheap static lane slices instead of an in-kernel reshape/transpose.
    k2, dout = w_flat.shape
    i = dout // hd
    return w_flat.reshape(k2, i, hd).transpose(0, 2, 1).reshape(k2, hd * i)


@jax.jit
def _deeponet_fused(x_branch, x_trunk, branch_params, trunk_params):
    B, d_branch = x_branch.shape
    N = x_trunk.shape[0]

    wb = [_flatten_weight(w) for w in branch_params]
    wb[-1] = _to_k_major(wb[-1], HD)
    wt = [_flatten_weight(w) for w in trunk_params]

    kernel = _make_deeponet_kernel(len(wb), len(wt), GRID_COUNT, HD)
    vmem = pl.BlockSpec(memory_space=pltpu.MemorySpace.VMEM)

    return pl.pallas_call(
        kernel,
        out_shape=jax.ShapeDtypeStruct((B, N, d_branch), jnp.float32),
        in_specs=[vmem, vmem] + [vmem] * (len(wb) + len(wt)),
        out_specs=vmem,
    )(x_branch, x_trunk, *wb, *wt)


def deeponet_forward(x_branch, x_trunk, branch_params, trunk_params):
    if trunk_params[-1].shape[-1] != HD:
        raise AssertionError("Output sizes of branch net and trunk net do not match.")
    if branch_params[-1].shape[-1] != x_branch.shape[1] * HD:
        raise AssertionError("Branch net output size is not D_branch * HD.")
    return _deeponet_fused(x_branch, x_trunk, branch_params, trunk_params)


# ---------------------------------------------------------------------------
# Pure-JAX reference (for a sanity check against the kernel)
# ---------------------------------------------------------------------------
def _grid_scalars(x):
    lo = jnp.min(x).astype(jnp.float32)
    hi = jnp.max(x).astype(jnp.float32)
    span = jnp.maximum(hi - lo, jnp.float32(1e-6))
    h = span / jnp.float32(GRID_COUNT - 1)
    return lo, h, 1.0 / h


def _reference_forward(x_branch, x_trunk, branch_params, trunk_params):
    hp = jax.lax.Precision.HIGHEST

    def rbfkan(x, params, lo, h, inv_h):
        for w in params:
            phi = jnp.concatenate(
                [jnp.exp(-jnp.square((x - (lo + g * h)) * inv_h))
                 for g in range(GRID_COUNT)], axis=-1)
            x = jnp.dot(phi, w.reshape(-1, w.shape[-1]), precision=hp)
        return x

    yb = rbfkan(x_branch, branch_params, *_grid_scalars(x_branch))
    yt = rbfkan(x_trunk, trunk_params, *_grid_scalars(x_trunk))
    yb3 = yb.reshape(x_branch.shape[0], x_branch.shape[1], HD)
    return jnp.einsum('bik,nk->bni', yb3, yt, precision=hp)


# ---------------------------------------------------------------------------
if __name__ == "__main__":
    key = jax.random.PRNGKey(0)
    k_xb, k_xt, k_pb, k_pt = jax.random.split(key, 4)

    B = 2            # number of load samples (batch)
    N = 16           # number of trunk query points
    D_BRANCH = 8     # input_dim_branch = loads.shape[1]
    D_TRUNK = 2      # input_dim_trunk = coordinates.shape[1]

    x_branch = jax.random.uniform(k_xb, (B, D_BRANCH), jnp.float32,
                                  minval=-1.0, maxval=1.0)
    x_trunk = jax.random.uniform(k_xt, (N, D_TRUNK), jnp.float32,
                                 minval=0.0, maxval=1.0)

    width_branch = define_kan_width(D_BRANCH, HID_BRANCH, NUM_LAYER_BRANCH,
                                    D_BRANCH * HD)     # [8, 5, 32]
    width_trunk = define_kan_width(D_TRUNK, HID_TRUNK, NUM_LAYER_TRUNK,
                                   HD)                 # [2, 5, 4]

    branch_params = init_rbfkan_params(k_pb, width_branch)
    trunk_params = init_rbfkan_params(k_pt, width_trunk)

    Y = deeponet_forward(x_branch, x_trunk, branch_params, trunk_params)
    Y = jax.block_until_ready(Y)

    assert Y.shape == (B, N, D_BRANCH), Y.shape
    assert Y.dtype == jnp.float32
    assert bool(jnp.all(jnp.isfinite(Y)))

    Y_ref = _reference_forward(x_branch, x_trunk, branch_params, trunk_params)
    assert bool(jnp.allclose(Y, Y_ref, rtol=5e-2, atol=1e-6)), (
        float(jnp.max(jnp.abs(Y - Y_ref))))

    print("KERNEL_OK")
</pallas_src>

<mosaic_0001>
module attributes {stable_mosaic.version = 11 : i64} {
  func.func @kernel(%arg0: memref<2x8xf32, #tpu.memory_space<vmem>>, %arg1: memref<16x2xf32, #tpu.memory_space<vmem>>, %arg2: memref<40x5xf32, #tpu.memory_space<vmem>>, %arg3: memref<25x32xf32, #tpu.memory_space<vmem>>, %arg4: memref<10x5xf32, #tpu.memory_space<vmem>>, %arg5: memref<25x4xf32, #tpu.memory_space<vmem>>, %arg6: memref<2x16x8xf32, #tpu.memory_space<vmem>>) attributes {dimension_semantics = [], scalar_prefetch = 0 : i64, scratch_operands = 0 : i64, tpu.core_type = #tpu.core_type<tc>} {
    %c0 = arith.constant 0 : index
    %c0_0 = arith.constant 0 : index
    %0 = vector.load %arg0[%c0, %c0_0] : memref<2x8xf32, #tpu.memory_space<vmem>>, vector<2x8xf32>
    %cst = arith.constant dense<0x7F800000> : vector<2xf32>
    %1 = vector.multi_reduction <minimumf>, %0, %cst [1] : vector<2x8xf32> to vector<2xf32>
    %2 = vector.shape_cast %1 : vector<2xf32> to vector<2x1xf32>
    %cst_1 = arith.constant dense<0x7F800000> : vector<1xf32>
    %3 = vector.multi_reduction <minimumf>, %2, %cst_1 [0] : vector<2x1xf32> to vector<1xf32>
    %4 = vector.shape_cast %3 : vector<1xf32> to vector<1x1xf32>
    %cst_2 = arith.constant dense<0xFF800000> : vector<2xf32>
    %5 = vector.multi_reduction <maximumf>, %0, %cst_2 [1] : vector<2x8xf32> to vector<2xf32>
    %6 = vector.shape_cast %5 : vector<2xf32> to vector<2x1xf32>
    %cst_3 = arith.constant dense<0xFF800000> : vector<1xf32>
    %7 = vector.multi_reduction <maximumf>, %6, %cst_3 [0] : vector<2x1xf32> to vector<1xf32>
    %8 = vector.shape_cast %7 : vector<1xf32> to vector<1x1xf32>
    %9 = arith.subf %8, %4 : vector<1x1xf32>
    %cst_4 = arith.constant 9.99999997E-7 : f32
    %10 = vector.broadcast %cst_4 : f32 to vector<1x1xf32>
    %11 = arith.maximumf %9, %10 : vector<1x1xf32>
    %cst_5 = arith.constant 4.000000e+00 : f32
    %12 = vector.broadcast %cst_5 : f32 to vector<1x1xf32>
    %13 = arith.divf %11, %12 : vector<1x1xf32>
    %cst_6 = arith.constant 1.000000e+00 : f32
    %14 = vector.broadcast %cst_6 : f32 to vector<1x1xf32>
    %15 = arith.divf %14, %13 : vector<1x1xf32>
    %cst_7 = arith.constant 0.000000e+00 : f32
    %16 = vector.broadcast %cst_7 : f32 to vector<1x1xf32>
    %17 = arith.mulf %16, %13 : vector<1x1xf32>
    %18 = arith.addf %4, %17 : vector<1x1xf32>
    %19 = vector.broadcast %18 : vector<1x1xf32> to vector<2x8xf32>
    %20 = arith.subf %0, %19 : vector<2x8xf32>
    %21 = vector.broadcast %15 : vector<1x1xf32> to vector<2x8xf32>
    %22 = arith.mulf %20, %21 : vector<2x8xf32>
    %23 = arith.mulf %22, %22 : vector<2x8xf32>
    %cst_8 = arith.constant 0.000000e+00 : f32
    %24 = vector.broadcast %cst_8 : f32 to vector<2x8xf32>
    %25 = arith.subf %24, %23 : vector<2x8xf32>
    %26 = math.exp %25 : vector<2x8xf32>
    %cst_9 = arith.constant 1.000000e+00 : f32
    %27 = vector.broadcast %cst_9 : f32 to vector<1x1xf32>
    %28 = arith.mulf %27, %13 : vector<1x1xf32>
    %29 = arith.addf %4, %28 : vector<1x1xf32>
    %30 = vector.broadcast %29 : vector<1x1xf32> to vector<2x8xf32>
    %31 = arith.subf %0, %30 : vector<2x8xf32>
    %32 = vector.broadcast %15 : vector<1x1xf32> to vector<2x8xf32>
    %33 = arith.mulf %31, %32 : vector<2x8xf32>
    %34 = arith.mulf %33, %33 : vector<2x8xf32>
    %cst_10 = arith.constant 0.000000e+00 : f32
    %35 = vector.broadcast %cst_10 : f32 to vector<2x8xf32>
    %36 = arith.subf %35, %34 : vector<2x8xf32>
    %37 = math.exp %36 : vector<2x8xf32>
    %cst_11 = arith.constant 2.000000e+00 : f32
    %38 = vector.broadcast %cst_11 : f32 to vector<1x1xf32>
    %39 = arith.mulf %38, %13 : vector<1x1xf32>
    %40 = arith.addf %4, %39 : vector<1x1xf32>
    %41 = vector.broadcast %40 : vector<1x1xf32> to vector<2x8xf32>
    %42 = arith.subf %0, %41 : vector<2x8xf32>
    %43 = vector.broadcast %15 : vector<1x1xf32> to vector<2x8xf32>
    %44 = arith.mulf %42, %43 : vector<2x8xf32>
    %45 = arith.mulf %44, %44 : vector<2x8xf32>
    %cst_12 = arith.constant 0.000000e+00 : f32
    %46 = vector.broadcast %cst_12 : f32 to vector<2x8xf32>
    %47 = arith.subf %46, %45 : vector<2x8xf32>
    %48 = math.exp %47 : vector<2x8xf32>
    %cst_13 = arith.constant 3.000000e+00 : f32
    %49 = vector.broadcast %cst_13 : f32 to vector<1x1xf32>
    %50 = arith.mulf %49, %13 : vector<1x1xf32>
    %51 = arith.addf %4, %50 : vector<1x1xf32>
    %52 = vector.broadcast %51 : vector<1x1xf32> to vector<2x8xf32>
    %53 = arith.subf %0, %52 : vector<2x8xf32>
    %54 = vector.broadcast %15 : vector<1x1xf32> to vector<2x8xf32>
    %55 = arith.mulf %53, %54 : vector<2x8xf32>
    %56 = arith.mulf %55, %55 : vector<2x8xf32>
    %cst_14 = arith.constant 0.000000e+00 : f32
    %57 = vector.broadcast %cst_14 : f32 to vector<2x8xf32>
    %58 = arith.subf %57, %56 : vector<2x8xf32>
    %59 = math.exp %58 : vector<2x8xf32>
    %cst_15 = arith.constant 4.000000e+00 : f32
    %60 = vector.broadcast %cst_15 : f32 to vector<1x1xf32>
    %61 = arith.mulf %60, %13 : vector<1x1xf32>
    %62 = arith.addf %4, %61 : vector<1x1xf32>
    %63 = vector.broadcast %62 : vector<1x1xf32> to vector<2x8xf32>
    %64 = arith.subf %0, %63 : vector<2x8xf32>
    %65 = vector.broadcast %15 : vector<1x1xf32> to vector<2x8xf32>
    %66 = arith.mulf %64, %65 : vector<2x8xf32>
    %67 = arith.mulf %66, %66 : vector<2x8xf32>
    %cst_16 = arith.constant 0.000000e+00 : f32
    %68 = vector.broadcast %cst_16 : f32 to vector<2x8xf32>
    %69 = arith.subf %68, %67 : vector<2x8xf32>
    %70 = math.exp %69 : vector<2x8xf32>
    %71 = tpu.concatenate %26, %37, %48, %59, %70 in 1 : vector<2x8xf32>, vector<2x8xf32>, vector<2x8xf32>, vector<2x8xf32>, vector<2x8xf32> -> vector<2x40xf32>
    %c0_17 = arith.constant 0 : index
    %c0_18 = arith.constant 0 : index
    %72 = vector.load %arg2[%c0_17, %c0_18] : memref<40x5xf32, #tpu.memory_space<vmem>>, vector<40x5xf32>
    %cst_19 = arith.constant dense<0.000000e+00> : vector<2x5xf32>
    %73 = tpu.matmul %71, %72, %cst_19 {dimension_numbers = #tpu.dot_dimension_numbers<[1], [0], [0], [1], [0, 0, 1, 1], [], []>} : vector<2x40xf32>, vector<40x5xf32>, vector<2x5xf32> -> vector<2x5xf32>
    %cst_20 = arith.constant 0.000000e+00 : f32
    %74 = vector.broadcast %cst_20 : f32 to vector<1x1xf32>
    %75 = arith.mulf %74, %13 : vector<1x1xf32>
    %76 = arith.addf %4, %75 : vector<1x1xf32>
    %77 = vector.broadcast %76 : vector<1x1xf32> to vector<2x5xf32>
    %78 = arith.subf %73, %77 : vector<2x5xf32>
    %79 = vector.broadcast %15 : vector<1x1xf32> to vector<2x5xf32>
    %80 = arith.mulf %78, %79 : vector<2x5xf32>
    %81 = arith.mulf %80, %80 : vector<2x5xf32>
    %cst_21 = arith.constant 0.000000e+00 : f32
    %82 = vector.broadcast %cst_21 : f32 to vector<2x5xf32>
    %83 = arith.subf %82, %81 : vector<2x5xf32>
    %84 = math.exp %83 : vector<2x5xf32>
    %cst_22 = arith.constant 1.000000e+00 : f32
    %85 = vector.broadcast %cst_22 : f32 to vector<1x1xf32>
    %86 = arith.mulf %85, %13 : vector<1x1xf32>
    %87 = arith.addf %4, %86 : vector<1x1xf32>
    %88 = vector.broadcast %87 : vector<1x1xf32> to vector<2x5xf32>
    %89 = arith.subf %73, %88 : vector<2x5xf32>
    %90 = vector.broadcast %15 : vector<1x1xf32> to vector<2x5xf32>
    %91 = arith.mulf %89, %90 : vector<2x5xf32>
    %92 = arith.mulf %91, %91 : vector<2x5xf32>
    %cst_23 = arith.constant 0.000000e+00 : f32
    %93 = vector.broadcast %cst_23 : f32 to vector<2x5xf32>
    %94 = arith.subf %93, %92 : vector<2x5xf32>
    %95 = math.exp %94 : vector<2x5xf32>
    %cst_24 = arith.constant 2.000000e+00 : f32
    %96 = vector.broadcast %cst_24 : f32 to vector<1x1xf32>
    %97 = arith.mulf %96, %13 : vector<1x1xf32>
    %98 = arith.addf %4, %97 : vector<1x1xf32>
    %99 = vector.broadcast %98 : vector<1x1xf32> to vector<2x5xf32>
    %100 = arith.subf %73, %99 : vector<2x5xf32>
    %101 = vector.broadcast %15 : vector<1x1xf32> to vector<2x5xf32>
    %102 = arith.mulf %100, %101 : vector<2x5xf32>
    %103 = arith.mulf %102, %102 : vector<2x5xf32>
    %cst_25 = arith.constant 0.000000e+00 : f32
    %104 = vector.broadcast %cst_25 : f32 to vector<2x5xf32>
    %105 = arith.subf %104, %103 : vector<2x5xf32>
    %106 = math.exp %105 : vector<2x5xf32>
    %cst_26 = arith.constant 3.000000e+00 : f32
    %107 = vector.broadcast %cst_26 : f32 to vector<1x1xf32>
    %108 = arith.mulf %107, %13 : vector<1x1xf32>
    %109 = arith.addf %4, %108 : vector<1x1xf32>
    %110 = vector.broadcast %109 : vector<1x1xf32> to vector<2x5xf32>
    %111 = arith.subf %73, %110 : vector<2x5xf32>
    %112 = vector.broadcast %15 : vector<1x1xf32> to vector<2x5xf32>
    %113 = arith.mulf %111, %112 : vector<2x5xf32>
    %114 = arith.mulf %113, %113 : vector<2x5xf32>
    %cst_27 = arith.constant 0.000000e+00 : f32
    %115 = vector.broadcast %cst_27 : f32 to vector<2x5xf32>
    %116 = arith.subf %115, %114 : vector<2x5xf32>
    %117 = math.exp %116 : vector<2x5xf32>
    %cst_28 = arith.constant 4.000000e+00 : f32
    %118 = vector.broadcast %cst_28 : f32 to vector<1x1xf32>
    %119 = arith.mulf %118, %13 : vector<1x1xf32>
    %120 = arith.addf %4, %119 : vector<1x1xf32>
    %121 = vector.broadcast %120 : vector<1x1xf32> to vector<2x5xf32>
    %122 = arith.subf %73, %121 : vector<2x5xf32>
    %123 = vector.broadcast %15 : vector<1x1xf32> to vector<2x5xf32>
    %124 = arith.mulf %122, %123 : vector<2x5xf32>
    %125 = arith.mulf %124, %124 : vector<2x5xf32>
    %cst_29 = arith.constant 0.000000e+00 : f32
    %126 = vector.broadcast %cst_29 : f32 to vector<2x5xf32>
    %127 = arith.subf %126, %125 : vector<2x5xf32>
    %128 = math.exp %127 : vector<2x5xf32>
    %129 = tpu.concatenate %84, %95, %106, %117, %128 in 1 : vector<2x5xf32>, vector<2x5xf32>, vector<2x5xf32>, vector<2x5xf32>, vector<2x5xf32> -> vector<2x25xf32>
    %c0_30 = arith.constant 0 : index
    %c0_31 = arith.constant 0 : index
    %130 = vector.load %arg3[%c0_30, %c0_31] : memref<25x32xf32, #tpu.memory_space<vmem>>, vector<25x32xf32>
    %cst_32 = arith.constant dense<0.000000e+00> : vector<2x32xf32>
    %131 = tpu.matmul %129, %130, %cst_32 {dimension_numbers = #tpu.dot_dimension_numbers<[1], [0], [0], [1], [0, 0, 1, 1], [], []>} : vector<2x25xf32>, vector<25x32xf32>, vector<2x32xf32> -> vector<2x32xf32>
    %c0_33 = arith.constant 0 : index
    %c0_34 = arith.constant 0 : index
    %132 = vector.load %arg1[%c0_33, %c0_34] : memref<16x2xf32, #tpu.memory_space<vmem>>, vector<16x2xf32>
    %cst_35 = arith.constant dense<0x7F800000> : vector<16xf32>
    %133 = vector.multi_reduction <minimumf>, %132, %cst_35 [1] : vector<16x2xf32> to vector<16xf32>
    %134 = vector.shape_cast %133 : vector<16xf32> to vector<16x1xf32>
    %cst_36 = arith.constant dense<0x7F800000> : vector<1xf32>
    %135 = vector.multi_reduction <minimumf>, %134, %cst_36 [0] : vector<16x1xf32> to vector<1xf32>
    %136 = vector.shape_cast %135 : vector<1xf32> to vector<1x1xf32>
    %cst_37 = arith.constant dense<0xFF800000> : vector<16xf32>
    %137 = vector.multi_reduction <maximumf>, %132, %cst_37 [1] : vector<16x2xf32> to vector<16xf32>
    %138 = vector.shape_cast %137 : vector<16xf32> to vector<16x1xf32>
    %cst_38 = arith.constant dense<0xFF800000> : vector<1xf32>
    %139 = vector.multi_reduction <maximumf>, %138, %cst_38 [0] : vector<16x1xf32> to vector<1xf32>
    %140 = vector.shape_cast %139 : vector<1xf32> to vector<1x1xf32>
    %141 = arith.subf %140, %136 : vector<1x1xf32>
    %cst_39 = arith.constant 9.99999997E-7 : f32
    %142 = vector.broadcast %cst_39 : f32 to vector<1x1xf32>
    %143 = arith.maximumf %141, %142 : vector<1x1xf32>
    %cst_40 = arith.constant 4.000000e+00 : f32
    %144 = vector.broadcast %cst_40 : f32 to vector<1x1xf32>
    %145 = arith.divf %143, %144 : vector<1x1xf32>
    %cst_41 = arith.constant 1.000000e+00 : f32
    %146 = vector.broadcast %cst_41 : f32 to vector<1x1xf32>
    %147 = arith.divf %146, %145 : vector<1x1xf32>
    %cst_42 = arith.constant 0.000000e+00 : f32
    %148 = vector.broadcast %cst_42 : f32 to vector<1x1xf32>
    %149 = arith.mulf %148, %145 : vector<1x1xf32>
    %150 = arith.addf %136, %149 : vector<1x1xf32>
    %151 = vector.broadcast %150 : vector<1x1xf32> to vector<16x2xf32>
    %152 = arith.subf %132, %151 : vector<16x2xf32>
    %153 = vector.broadcast %147 : vector<1x1xf32> to vector<16x2xf32>
    %154 = arith.mulf %152, %153 : vector<16x2xf32>
    %155 = arith.mulf %154, %154 : vector<16x2xf32>
    %cst_43 = arith.constant 0.000000e+00 : f32
    %156 = vector.broadcast %cst_43 : f32 to vector<16x2xf32>
    %157 = arith.subf %156, %155 : vector<16x2xf32>
    %158 = math.exp %157 : vector<16x2xf32>
    %cst_44 = arith.constant 1.000000e+00 : f32
    %159 = vector.broadcast %cst_44 : f32 to vector<1x1xf32>
    %160 = arith.mulf %159, %145 : vector<1x1xf32>
    %161 = arith.addf %136, %160 : vector<1x1xf32>
    %162 = vector.broadcast %161 : vector<1x1xf32> to vector<16x2xf32>
    %163 = arith.subf %132, %162 : vector<16x2xf32>
    %164 = vector.broadcast %147 : vector<1x1xf32> to vector<16x2xf32>
    %165 = arith.mulf %163, %164 : vector<16x2xf32>
    %166 = arith.mulf %165, %165 : vector<16x2xf32>
    %cst_45 = arith.constant 0.000000e+00 : f32
    %167 = vector.broadcast %cst_45 : f32 to vector<16x2xf32>
    %168 = arith.subf %167, %166 : vector<16x2xf32>
    %169 = math.exp %168 : vector<16x2xf32>
    %cst_46 = arith.constant 2.000000e+00 : f32
    %170 = vector.broadcast %cst_46 : f32 to vector<1x1xf32>
    %171 = arith.mulf %170, %145 : vector<1x1xf32>
    %172 = arith.addf %136, %171 : vector<1x1xf32>
    %173 = vector.broadcast %172 : vector<1x1xf32> to vector<16x2xf32>
    %174 = arith.subf %132, %173 : vector<16x2xf32>
    %175 = vector.broadcast %147 : vector<1x1xf32> to vector<16x2xf32>
    %176 = arith.mulf %174, %175 : vector<16x2xf32>
    %177 = arith.mulf %176, %176 : vector<16x2xf32>
    %cst_47 = arith.constant 0.000000e+00 : f32
    %178 = vector.broadcast %cst_47 : f32 to vector<16x2xf32>
    %179 = arith.subf %178, %177 : vector<16x2xf32>
    %180 = math.exp %179 : vector<16x2xf32>
    %cst_48 = arith.constant 3.000000e+00 : f32
    %181 = vector.broadcast %cst_48 : f32 to vector<1x1xf32>
    %182 = arith.mulf %181, %145 : vector<1x1xf32>
    %183 = arith.addf %136, %182 : vector<1x1xf32>
    %184 = vector.broadcast %183 : vector<1x1xf32> to vector<16x2xf32>
    %185 = arith.subf %132, %184 : vector<16x2xf32>
    %186 = vector.broadcast %147 : vector<1x1xf32> to vector<16x2xf32>
    %187 = arith.mulf %185, %186 : vector<16x2xf32>
    %188 = arith.mulf %187, %187 : vector<16x2xf32>
    %cst_49 = arith.constant 0.000000e+00 : f32
    %189 = vector.broadcast %cst_49 : f32 to vector<16x2xf32>
    %190 = arith.subf %189, %188 : vector<16x2xf32>
    %191 = math.exp %190 : vector<16x2xf32>
    %cst_50 = arith.constant 4.000000e+00 : f32
    %192 = vector.broadcast %cst_50 : f32 to vector<1x1xf32>
    %193 = arith.mulf %192, %145 : vector<1x1xf32>
    %194 = arith.addf %136, %193 : vector<1x1xf32>
    %195 = vector.broadcast %194 : vector<1x1xf32> to vector<16x2xf32>
    %196 = arith.subf %132, %195 : vector<16x2xf32>
    %197 = vector.broadcast %147 : vector<1x1xf32> to vector<16x2xf32>
    %198 = arith.mulf %196, %197 : vector<16x2xf32>
    %199 = arith.mulf %198, %198 : vector<16x2xf32>
    %cst_51 = arith.constant 0.000000e+00 : f32
    %200 = vector.broadcast %cst_51 : f32 to vector<16x2xf32>
    %201 = arith.subf %200, %199 : vector<16x2xf32>
    %202 = math.exp %201 : vector<16x2xf32>
    %203 = tpu.concatenate %158, %169, %180, %191, %202 in 1 : vector<16x2xf32>, vector<16x2xf32>, vector<16x2xf32>, vector<16x2xf32>, vector<16x2xf32> -> vector<16x10xf32>
    %c0_52 = arith.constant 0 : index
    %c0_53 = arith.constant 0 : index
    %204 = vector.load %arg4[%c0_52, %c0_53] : memref<10x5xf32, #tpu.memory_space<vmem>>, vector<10x5xf32>
    %cst_54 = arith.constant dense<0.000000e+00> : vector<16x5xf32>
    %205 = tpu.matmul %203, %204, %cst_54 {dimension_numbers = #tpu.dot_dimension_numbers<[1], [0], [0], [1], [0, 0, 1, 1], [], []>} : vector<16x10xf32>, vector<10x5xf32>, vector<16x5xf32> -> vector<16x5xf32>
    %cst_55 = arith.constant 0.000000e+00 : f32
    %206 = vector.broadcast %cst_55 : f32 to vector<1x1xf32>
    %207 = arith.mulf %206, %145 : vector<1x1xf32>
    %208 = arith.addf %136, %207 : vector<1x1xf32>
    %209 = vector.broadcast %208 : vector<1x1xf32> to vector<16x5xf32>
    %210 = arith.subf %205, %209 : vector<16x5xf32>
    %211 = vector.broadcast %147 : vector<1x1xf32> to vector<16x5xf32>
    %212 = arith.mulf %210, %211 : vector<16x5xf32>
    %213 = arith.mulf %212, %212 : vector<16x5xf32>
    %cst_56 = arith.constant 0.000000e+00 : f32
    %214 = vector.broadcast %cst_56 : f32 to vector<16x5xf32>
    %215 = arith.subf %214, %213 : vector<16x5xf32>
    %216 = math.exp %215 : vector<16x5xf32>
    %cst_57 = arith.constant 1.000000e+00 : f32
    %217 = vector.broadcast %cst_57 : f32 to vector<1x1xf32>
    %218 = arith.mulf %217, %145 : vector<1x1xf32>
    %219 = arith.addf %136, %218 : vector<1x1xf32>
    %220 = vector.broadcast %219 : vector<1x1xf32> to vector<16x5xf32>
    %221 = arith.subf %205, %220 : vector<16x5xf32>
    %222 = vector.broadcast %147 : vector<1x1xf32> to vector<16x5xf32>
    %223 = arith.mulf %221, %222 : vector<16x5xf32>
    %224 = arith.mulf %223, %223 : vector<16x5xf32>
    %cst_58 = arith.constant 0.000000e+00 : f32
    %225 = vector.broadcast %cst_58 : f32 to vector<16x5xf32>
    %226 = arith.subf %225, %224 : vector<16x5xf32>
    %227 = math.exp %226 : vector<16x5xf32>
    %cst_59 = arith.constant 2.000000e+00 : f32
    %228 = vector.broadcast %cst_59 : f32 to vector<1x1xf32>
    %229 = arith.mulf %228, %145 : vector<1x1xf32>
    %230 = arith.addf %136, %229 : vector<1x1xf32>
    %231 = vector.broadcast %230 : vector<1x1xf32> to vector<16x5xf32>
    %232 = arith.subf %205, %231 : vector<16x5xf32>
    %233 = vector.broadcast %147 : vector<1x1xf32> to vector<16x5xf32>
    %234 = arith.mulf %232, %233 : vector<16x5xf32>
    %235 = arith.mulf %234, %234 : vector<16x5xf32>
    %cst_60 = arith.constant 0.000000e+00 : f32
    %236 = vector.broadcast %cst_60 : f32 to vector<16x5xf32>
    %237 = arith.subf %236, %235 : vector<16x5xf32>
    %238 = math.exp %237 : vector<16x5xf32>
    %cst_61 = arith.constant 3.000000e+00 : f32
    %239 = vector.broadcast %cst_61 : f32 to vector<1x1xf32>
    %240 = arith.mulf %239, %145 : vector<1x1xf32>
    %241 = arith.addf %136, %240 : vector<1x1xf32>
    %242 = vector.broadcast %241 : vector<1x1xf32> to vector<16x5xf32>
    %243 = arith.subf %205, %242 : vector<16x5xf32>
    %244 = vector.broadcast %147 : vector<1x1xf32> to vector<16x5xf32>
    %245 = arith.mulf %243, %244 : vector<16x5xf32>
    %246 = arith.mulf %245, %245 : vector<16x5xf32>
    %cst_62 = arith.constant 0.000000e+00 : f32
    %247 = vector.broadcast %cst_62 : f32 to vector<16x5xf32>
    %248 = arith.subf %247, %246 : vector<16x5xf32>
    %249 = math.exp %248 : vector<16x5xf32>
    %cst_63 = arith.constant 4.000000e+00 : f32
    %250 = vector.broadcast %cst_63 : f32 to vector<1x1xf32>
    %251 = arith.mulf %250, %145 : vector<1x1xf32>
    %252 = arith.addf %136, %251 : vector<1x1xf32>
    %253 = vector.broadcast %252 : vector<1x1xf32> to vector<16x5xf32>
    %254 = arith.subf %205, %253 : vector<16x5xf32>
    %255 = vector.broadcast %147 : vector<1x1xf32> to vector<16x5xf32>
    %256 = arith.mulf %254, %255 : vector<16x5xf32>
    %257 = arith.mulf %256, %256 : vector<16x5xf32>
    %cst_64 = arith.constant 0.000000e+00 : f32
    %258 = vector.broadcast %cst_64 : f32 to vector<16x5xf32>
    %259 = arith.subf %258, %257 : vector<16x5xf32>
    %260 = math.exp %259 : vector<16x5xf32>
    %261 = tpu.concatenate %216, %227, %238, %249, %260 in 1 : vector<16x5xf32>, vector<16x5xf32>, vector<16x5xf32>, vector<16x5xf32>, vector<16x5xf32> -> vector<16x25xf32>
    %c0_65 = arith.constant 0 : index
    %c0_66 = arith.constant 0 : index
    %262 = vector.load %arg5[%c0_65, %c0_66] : memref<25x4xf32, #tpu.memory_space<vmem>>, vector<25x4xf32>
    %cst_67 = arith.constant dense<0.000000e+00> : vector<16x4xf32>
    %263 = tpu.matmul %261, %262, %cst_67 {dimension_numbers = #tpu.dot_dimension_numbers<[1], [0], [0], [1], [0, 0, 1, 1], [], []>} : vector<16x25xf32>, vector<25x4xf32>, vector<16x4xf32> -> vector<16x4xf32>
    %264 = vector.extract_strided_slice %131 {offsets = [0, 0], sizes = [2, 8], strides = [1, 1]} : vector<2x32xf32> to vector<2x8xf32>
    %265 = vector.extract_strided_slice %263 {offsets = [0, 0], sizes = [16, 1], strides = [1, 1]} : vector<16x4xf32> to vector<16x1xf32>
    %266 = vector.shape_cast %265 : vector<16x1xf32> to vector<1x16x1xf32>
    %267 = vector.shape_cast %264 : vector<2x8xf32> to vector<2x1x8xf32>
    %268 = vector.broadcast %266 : vector<1x16x1xf32> to vector<2x16x8xf32>
    %269 = vector.broadcast %267 : vector<2x1x8xf32> to vector<2x16x8xf32>
    %270 = arith.mulf %268, %269 : vector<2x16x8xf32>
    %271 = vector.extract_strided_slice %131 {offsets = [0, 8], sizes = [2, 8], strides = [1, 1]} : vector<2x32xf32> to vector<2x8xf32>
    %272 = vector.extract_strided_slice %263 {offsets = [0, 1], sizes = [16, 1], strides = [1, 1]} : vector<16x4xf32> to vector<16x1xf32>
    %273 = vector.shape_cast %272 : vector<16x1xf32> to vector<1x16x1xf32>
    %274 = vector.shape_cast %271 : vector<2x8xf32> to vector<2x1x8xf32>
    %275 = vector.broadcast %273 : vector<1x16x1xf32> to vector<2x16x8xf32>
    %276 = vector.broadcast %274 : vector<2x1x8xf32> to vector<2x16x8xf32>
    %277 = arith.mulf %275, %276 : vector<2x16x8xf32>
    %278 = arith.addf %270, %277 : vector<2x16x8xf32>
    %279 = vector.extract_strided_slice %131 {offsets = [0, 16], sizes = [2, 8], strides = [1, 1]} : vector<2x32xf32> to vector<2x8xf32>
    %280 = vector.extract_strided_slice %263 {offsets = [0, 2], sizes = [16, 1], strides = [1, 1]} : vector<16x4xf32> to vector<16x1xf32>
    %281 = vector.shape_cast %280 : vector<16x1xf32> to vector<1x16x1xf32>
    %282 = vector.shape_cast %279 : vector<2x8xf32> to vector<2x1x8xf32>
    %283 = vector.broadcast %281 : vector<1x16x1xf32> to vector<2x16x8xf32>
    %284 = vector.broadcast %282 : vector<2x1x8xf32> to vector<2x16x8xf32>
    %285 = arith.mulf %283, %284 : vector<2x16x8xf32>
    %286 = arith.addf %278, %285 : vector<2x16x8xf32>
    %287 = vector.extract_strided_slice %131 {offsets = [0, 24], sizes = [2, 8], strides = [1, 1]} : vector<2x32xf32> to vector<2x8xf32>
    %288 = vector.extract_strided_slice %263 {offsets = [0, 3], sizes = [16, 1], strides = [1, 1]} : vector<16x4xf32> to vector<16x1xf32>
    %289 = vector.shape_cast %288 : vector<16x1xf32> to vector<1x16x1xf32>
    %290 = vector.shape_cast %287 : vector<2x8xf32> to vector<2x1x8xf32>
    %291 = vector.broadcast %289 : vector<1x16x1xf32> to vector<2x16x8xf32>
    %292 = vector.broadcast %290 : vector<2x1x8xf32> to vector<2x16x8xf32>
    %293 = arith.mulf %291, %292 : vector<2x16x8xf32>
    %294 = arith.addf %286, %293 : vector<2x16x8xf32>
    %c0_68 = arith.constant 0 : index
    %c0_69 = arith.constant 0 : index
    %c0_70 = arith.constant 0 : index
    %295 = vector.load %arg6[%c0_68, %c0_69, %c0_70] : memref<2x16x8xf32, #tpu.memory_space<vmem>>, vector<2x16x8xf32>
    tpu.vector_store %arg6[%c0_68, %c0_69, %c0_70], %294 {strides = array<i32>} : memref<2x16x8xf32, #tpu.memory_space<vmem>>, vector<2x16x8xf32>,
    return
  }
}

</mosaic_0001>

<bundles_post_ra>
// kernel: _deeponet_fused.1
= control target key start
LH: loop header
LB: loop body
LE: loop exit
PB: predicated region body
PF: predicated region fallthrough
CT: control target
= control target key end

     0   :  { %vm24_vm0 = vcmask 58368   ;;  %v1097_v3 = vmov 0.0|0.0   ;;  %vm28_vm1 = vcmask 1041408   ;;  %v1098_v59 = vmov 0.0   ;;  %s1100_s8 = smov 24   ;;  %s1101_s9 = smov 8   ;;  %s1432_s0 = inlined_call_operand.vmem [shape: f32[2,8], index: 0, kind: input, shape index: {}]   ;;  %s1433_s2 = inlined_call_operand.vmem [shape: f32[40,5], index: 2, kind: input, shape index: {}]   ;;  %s1434_s1 = inlined_call_operand.vmem [shape: f32[16,2], index: 1, kind: input, shape index: {}]   ;;  %s1435_s3 = inlined_call_operand.vmem [shape: f32[25,32], index: 3, kind: input, shape index: {}]   ;;  %s1436_s4 = inlined_call_operand.vmem [shape: f32[10,5], index: 4, kind: input, shape index: {}]   ;;  %s1437_s5 = inlined_call_operand.vmem [shape: f32[25,4], index: 5, kind: input, shape index: {}]   ;;  %s1438_s6 = inlined_call_operand.vmem [shape: f32[2,16,8], index: 6, kind: output, shape index: {}]  }
   0x1   :  { %v1158_v0 = vld [vmem:[%s1432_s0] sm:$0x3]  ;;  %972 = vmatprep.subr.bf16.mxu0 %v1097_v3  ;;  %978 = vmatprep.subr.bf16.mxu1 %v1097_v3  ;;  %v116_v51 = vld [vmem:[%s1433_s2 + $0x8] sm:$0xff]  ;;  %v117_v55 = vld [vmem:[%s1433_s2 + $0x10] sm:$0xff]  ;;  %vm1099_vm2 = vmmov 0   ;;  %s1102_s10 = smov 16  }
   0x2   :  { %v25_v1 = vsel %vm24_vm0, %v1158_v0, inf  ;;  %v36_v2 = vsel %vm24_vm0, %v1158_v0, -inf  ;;  %v115_v50 = vld [vmem:[%s1433_s2] sm:$0xff]  ;;  %v118_v56 = vld [vmem:[%s1433_s2 + $0x18] sm:$0xff]  ;;  %940 = vmatprep.mubr.msk.f32.mxu0 %vm1099_vm2, %v1098_v59  ;;  %951 = vmatprep.mubr.msk.f32.mxu1 %vm1099_vm2, %v1098_v59  ;;  %s1103_s11 = smov 32   ;;  %vm332_vm3 = vcmask 15360  }
   0x3   :  { %26 = vmin.xlane.f32.xlu0 %v25_v1  ;;  %v973_v52 = vpack.c.bf16 %v116_v51, %v115_v50  ;;  %v976_v57 = vpack.c.bf16 %v118_v56, %v117_v55  ;;  %v119_v60 = vld [vmem:[%s1433_s2 + $0x20] sm:$0xff]  ;;  %vm107_vm4 = vcmask 64512   ;;  %vm109_vm5 = vcmask 130048   ;;  %s1105_s15 = smov 4   ;;  %s1106_s16 = smov 6  }
   0x4   :  { %vm111_vm6 = vcmask 195584   ;;  %vm113_vm7 = vcmask 261120   ;;  %vm120_vm8 = vcmask 326656   ;;  %vm256_vm9 = vcmask 1040384   ;;  %s1108_s27 = smov 5   ;;  %s1109_s28 = smov 10  }
   0x5   :  { %974 = vmatpush3.bf16.msra.mxu0 %v973_v52  ;;  %vm1107_vm10 = vmmov 1   ;;  %s1111_s29 = smov 20   ;;  %vm240_vm13 = vcmask 39936   ;;  %vm242_vm14 = vcmask 80896   ;;  %vm244_vm15 = vcmask 121856   ;;  %s1118_s13 = smov 112  }
   0x6   :  { %975 = vmatprep.subr.bf16.mxu0 %v1097_v3  ;;  %vm1293_vm11 = vmpackc.low %vm256_vm9, %vm1107_vm10  ;;  %vm246_vm0 = vcmask 162816   ;;  %vm467_vm2 = vcmask 31744   ;;  %s1119_s14 = smov 104  }
   0x7   :  { %37 = vmax.xlane.f32.xlu0 %v36_v2  ;;  %v1210_v2 = vld [vmem:[%s1434_s1 + $0x8] sm:$0xff]  ;;  %vm1306_vm12 = vmpackc.low %vm28_vm1, %vm1107_vm10 }
   0x9   :  { %977 = vmatpush3.bf16.msra.mxu0 %v976_v57 }
   0xa   :  { %938 = vmatprep.subr.mxu0 %v1098_v59 }
   0xd   :  { %939 = vmatpush3.msra.mxu0 %v119_v60 }
  0x90   :  { %v27_v4 = vpop.xlane.xlu0 %26 }
  0x91   :  { %v29_v5 = vsel %vm28_vm1, %v27_v4, inf  ;;  %v336_v4 = vsel %vm332_vm3, %v1210_v2, inf }
  0x92   :  { %v30_v6 = vrot.slane %v29_v5, 4 }
  0x94   :  { %v31_v7 = vmin.f32 %v29_v5, %v30_v6  ;;  %v38_v8 = vpop.xlane.xlu0 %37  ;;  %v1217_v5 = vld [vmem:[%s1434_s1] sm:$0xff]  ;;  %s1104_s1 = smov 2  }
  0x95   :  { %v39_v9 = vsel %vm28_vm1, %v38_v8, -inf  ;;  %v333_v6 = vsel %vm332_vm3, %v1217_v5, inf  ;;  %v349_v8 = vsel %vm332_vm3, %v1210_v2, -inf  ;;  %vm252_vm1 = vcmask 203776  }
  0x96   :  { %v32_v10 = vrot.slane %v31_v7, 2  ;;  %v40_v11 = vrot.slane %v39_v9, 4 }
  0x98   :  { %v33_v12 = vmin.f32 %v31_v7, %v32_v10  ;;  %v41_v13 = vmax.f32 %v39_v9, %v40_v11  ;;  %v346_v7 = vsel %vm332_vm3, %v1217_v5, -inf }
  0x9a   :  { %v42_v14 = vrot.slane %v41_v13, 2  ;;  %v34_v15 = vrot.slane %v33_v12, 1 }
  0x9c   :  { %v43_v16 = vmax.f32 %v41_v13, %v42_v14  ;;  %v35_v18 = vmin.f32 %v33_v12, %v34_v15 }
  0x9e   :  { %v44_v17 = vrot.slane %v43_v16, 1 }
  0xa0   :  { %v45_v19 = vmax.f32 %v43_v16, %v44_v17 }
  0xa2   :  { %v46_v20 = vsub.f32 %v45_v19, %v35_v18 }
  0xa4   :  { %v47_v21 = vmax.f32 %v46_v20, 1e-06 }
  0xa6   :  { %v49_v22 = vmul.f32 0.25, %v47_v21 }
  0xa8   :  { %1033 = vrcp.f32 %v49_v22  ;;  %v52_v23 = vmul.f32 0.0, %v49_v22  ;;  %v67_v24 = vmul.f32 2.0, %v49_v22  ;;  %v75_v25 = vmul.f32 3.0, %v49_v22 }
  0xa9   :  { %v83_v27 = vmul.f32 4.0, %v49_v22  ;;  %v1172_v30 = vadd.f32 %v49_v22, %v35_v18 }
  0xaa   :  { %v1166_v26 = vadd.f32 %v52_v23, %v35_v18  ;;  %v1168_v28 = vadd.f32 %v67_v24, %v35_v18  ;;  %v1170_v29 = vadd.f32 %v75_v25, %v35_v18 }
  0xab   :  { %v1174_v31 = vadd.f32 %v83_v27, %v35_v18  ;;  %v61_v33 = vsub.f32 %v1158_v0, %v1172_v30 }
  0xac   :  { %v77_v32 = vsub.f32 %v1158_v0, %v1170_v29  ;;  %v69_v34 = vsub.f32 %v1158_v0, %v1168_v28  ;;  %v54_v9 = vsub.f32 %v1158_v0, %v1166_v26 }
  0xad   :  { %v85_v36 = vsub.f32 %v1158_v0, %v1174_v31 }
  0xb2   :  { %v1182_v35 = vpop.eup %1033 }
  0xb3   :  { %v78_v37 = vmul.f32 %v1182_v35, %v77_v32  ;;  %v62_v38 = vmul.f32 %v1182_v35, %v61_v33  ;;  %v70_v39 = vmul.f32 %v1182_v35, %v69_v34  ;;  %v86_v40 = vmul.f32 %v1182_v35, %v85_v36 }
  0xb4   :  { %v55_v10 = vmul.f32 %v1182_v35, %v54_v9 }
  0xb5   :  { %v79_v41 = vmul.f32 %v78_v37, %v78_v37  ;;  %v63_v42 = vmul.f32 %v62_v38, %v62_v38  ;;  %v71_v43 = vmul.f32 %v70_v39, %v70_v39  ;;  %v87_v47 = vmul.f32 %v86_v40, %v86_v40 }
  0xb6   :  { %v56_v11 = vmul.f32 %v55_v10, %v55_v10 }
  0xb7   :  { %v80_v44 = vsub.f32 0.0, %v79_v41  ;;  %v64_v45 = vsub.f32 0.0, %v63_v42  ;;  %v72_v46 = vsub.f32 0.0, %v71_v43  ;;  %v88_v54 = vsub.f32 0.0, %v87_v47 }
  0xb8   :  { %v57_v12 = vsub.f32 0.0, %v56_v11 }
  0xb9   :  { %v81_v48 = vmul.f32 1.442695, %v80_v44  ;;  %v65_v49 = vmul.f32 1.442695, %v64_v45  ;;  %v73_v53 = vmul.f32 1.442695, %v72_v46 }
  0xba   :  { %v89_v58 = vmul.f32 1.442695, %v88_v54  ;;  %v58_v13 = vmul.f32 1.442695, %v57_v12 }
  0xbb   :  { %1035 = vpow2.f32 %v81_v48 }
  0xbc   :  { %1037 = vpow2.f32 %v65_v49 }
  0xbd   :  { %1039 = vpow2.f32 %v73_v53 }
  0xbe   :  { %1041 = vpow2.f32 %v89_v58 }
  0xbf   :  { %1043 = vpow2.f32 %v58_v13 }
  0xc5   :  { %v1036_v61 = vpop.eup %1035 }
  0xc6   :  { %v1038_v62 = vpop.eup %1037  ;;  %100 = vrot.lane.b32.xlu0 %v1036_v61, %s1100_s8 }
  0xc7   :  { %92 = vrot.lane.b32.xlu1 %v1038_v62, %s1101_s9  ;;  %v1040_v63 = vpop.eup %1039 }
  0xc8   :  { %v1042_v1 = vpop.eup %1041 }
  0xc9   :  { %v1044_v15 = vpop.eup %1043 }
  0xcb   :  { %96 = vrot.lane.b32.xlu1 %v1040_v63, %s1102_s10 }
  0xcf   :  { %104 = vrot.lane.b32.xlu1 %v1042_v1, %s1103_s11 }
  0xe5   :  { %337 = vmin.xlane.f32.xlu0 %v336_v4 }
  0xf3   :  { %334 = vmin.xlane.f32.xlu1 %v333_v6 }
  0xf7   :  { %347 = vmax.xlane.f32.xlu1 %v346_v7 }
  0xfb   :  { %350 = vmax.xlane.f32.xlu1 %v349_v8 }
 0x138   :  { %v101_v19 = vpop.permute.xlu0 %100 }
 0x139   :  { %v93_v14 = vpop.permute.xlu1 %92 }
 0x13a   :  { %v108_v16 = vsel %vm107_vm4, %v1044_v15, %v93_v14 }
 0x13d   :  { %v97_v17 = vpop.permute.xlu1 %96 }
 0x13e   :  { %v110_v18 = vsel %vm109_vm5, %v108_v16, %v97_v17  ;;  %vm470_vm5 = vcmask 48128  }
 0x13f   :  { %v112_v0 = vsel %vm111_vm6, %v110_v18, %v101_v19 }
 0x141   :  { %v105_v20 = vpop.permute.xlu1 %104 }
 0x142   :  { %v114_v21 = vsel %vm113_vm7, %v112_v0, %v105_v20 }
 0x143   :  { %941 = vmatmul.mubr.msk.f32.vlgmr.msra.gmra.mrb[0].mxu0 %vm120_vm8, %v114_v21 }
 0x172   :  { %v338_v22 = vpop.xlane.xlu0 %337 }
 0x180   :  { %v335_v23 = vpop.xlane.xlu1 %334 }
 0x181   :  { %v339_v24 = vmin.f32 %v335_v23, %v338_v22 }
 0x183   :  { %v340_v25 = vrot.slane %v339_v24, 4 }
 0x184   :  { %v348_v27 = vpop.xlane.xlu1 %347 }
 0x185   :  { %v341_v32 = vmin.f32 %v339_v24, %v340_v25 }
 0x187   :  { %v342_v33 = vrot.slane %v341_v32, 2 }
 0x188   :  { %v351_v34 = vpop.xlane.xlu1 %350 }
 0x189   :  { %v352_v36 = vmax.f32 %v348_v27, %v351_v34  ;;  %v343_v37 = vmin.f32 %v341_v32, %v342_v33 }
 0x18b   :  { %v353_v38 = vrot.slane %v352_v36, 4  ;;  %v344_v40 = vrot.slane %v343_v37, 1 }
 0x18d   :  { %v354_v39 = vmax.f32 %v352_v36, %v353_v38  ;;  %v345_v43 = vmin.f32 %v343_v37, %v344_v40 }
 0x18f   :  { %v355_v41 = vrot.slane %v354_v39, 2 }
 0x191   :  { %v356_v42 = vmax.f32 %v354_v39, %v355_v41 }
 0x193   :  { %v357_v44 = vrot.slane %v356_v42, 1 }
 0x195   :  { %v358_v45 = vmax.f32 %v356_v42, %v357_v44 }
 0x197   :  { %v359_v46 = vsub.f32 %v358_v45, %v345_v43 }
 0x199   :  { %v360_v47 = vmax.f32 %v359_v46, 1e-06 }
 0x19b   :  { %v361_v48 = vmul.f32 0.25, %v360_v47 }
 0x19d   :  { %1045 = vrcp.f32 %v361_v48  ;;  %v364_v49 = vmul.f32 0.0, %v361_v48  ;;  %v391_v50 = vmul.f32 2.0, %v361_v48  ;;  %v405_v51 = vmul.f32 3.0, %v361_v48 }
 0x19e   :  { %v419_v52 = vmul.f32 4.0, %v361_v48  ;;  %v1231_v54 = vadd.f32 %v361_v48, %v345_v43 }
 0x19f   :  { %v1229_v53 = vadd.f32 %v364_v49, %v345_v43  ;;  %v1233_v55 = vadd.f32 %v391_v50, %v345_v43  ;;  %v1237_v57 = vadd.f32 %v405_v51, %v345_v43 }
 0x1a0   :  { %v1235_v56 = vadd.f32 %v419_v52, %v345_v43  ;;  %v380_v58 = vsub.f32 %v1210_v2, %v1231_v54  ;;  %v379_v59 = vsub.f32 %v1217_v5, %v1231_v54 }
 0x1a1   :  { %v394_v60 = vsub.f32 %v1210_v2, %v1233_v55  ;;  %v393_v61 = vsub.f32 %v1217_v5, %v1233_v55  ;;  %v407_v62 = vsub.f32 %v1217_v5, %v1237_v57  ;;  %v408_v33 = vsub.f32 %v1210_v2, %v1237_v57 }
 0x1a2   :  { %v422_v41 = vsub.f32 %v1210_v2, %v1235_v56 }
 0x1a7   :  { %v1249_v63 = vpop.eup %1045 }
 0x1a8   :  { %v382_v1 = vmul.f32 %v1249_v63, %v380_v58  ;;  %v381_v4 = vmul.f32 %v1249_v63, %v379_v59  ;;  %v396_v6 = vmul.f32 %v1249_v63, %v394_v60  ;;  %v395_v7 = vmul.f32 %v1249_v63, %v393_v61 }
 0x1a9   :  { %v409_v8 = vmul.f32 %v1249_v63, %v407_v62  ;;  %v410_v36 = vmul.f32 %v1249_v63, %v408_v33  ;;  %v424_v49 = vmul.f32 %v1249_v63, %v422_v41 }
 0x1aa   :  { %v384_v9 = vmul.f32 %v382_v1, %v382_v1  ;;  %v383_v10 = vmul.f32 %v381_v4, %v381_v4  ;;  %v398_v11 = vmul.f32 %v396_v6, %v396_v6  ;;  %v397_v12 = vmul.f32 %v395_v7, %v395_v7  ;;  %v248_v4 = vld [vmem:[%s1435_s3] sm:$0xff]  ;;  %v249_v6 = vld [vmem:[%s1435_s3 + $0x8] sm:$0xff] }
 0x1ab   :  { %v411_v13 = vmul.f32 %v409_v8, %v409_v8  ;;  %v412_v46 = vmul.f32 %v410_v36, %v410_v36  ;;  %v426_v62 = vmul.f32 %v424_v49, %v424_v49 }
 0x1ac   :  { %v386_v14 = vsub.f32 0.0, %v384_v9  ;;  %v385_v15 = vsub.f32 0.0, %v383_v10  ;;  %v400_v16 = vsub.f32 0.0, %v398_v11  ;;  %v399_v17 = vsub.f32 0.0, %v397_v12  ;;  %v250_v12 = vld [vmem:[%s1435_s3 + $0x10] sm:$0xff] }
 0x1ad   :  { %v413_v21 = vsub.f32 0.0, %v411_v13  ;;  %v414_v61 = vsub.f32 0.0, %v412_v46  ;;  %v979_v9 = vpack.c.bf16 %v249_v6, %v248_v4  ;;  %v428_v11 = vsub.f32 0.0, %v426_v62  ;;  %v251_v13 = vld [vmem:[%s1435_s3 + $0x18] sm:$0x1] }
 0x1ae   :  { %v389_v18 = vmul.f32 1.442695, %v386_v14  ;;  %v387_v19 = vmul.f32 1.442695, %v385_v15  ;;  %v403_v20 = vmul.f32 1.442695, %v400_v16  ;;  %v982_v16 = vpack.c.bf16 %v251_v13, %v250_v12 }
 0x1af   :  { %v401_v0 = vmul.f32 1.442695, %v399_v17  ;;  %v415_v22 = vmul.f32 1.442695, %v413_v21  ;;  %v417_v10 = vmul.f32 1.442695, %v414_v61  ;;  %980 = vmatpush3.bf16.msra.mxu1 %v979_v9 }
 0x1b0   :  { %1047 = vpow2.f32 %v389_v18  ;;  %981 = vmatprep.subr.bf16.mxu1 %v1097_v3  ;;  %v431_v3 = vmul.f32 1.442695, %v428_v11 }
 0x1b1   :  { %1049 = vpow2.f32 %v387_v19  ;;  %v475_v19 = vld [vmem:[%s1436_s4] sm:$0xff] }
 0x1b2   :  { %1051 = vpow2.f32 %v403_v20  ;;  %v476_v20 = vld [vmem:[%s1436_s4 + $0x8] sm:$0x3]  ;;  %s1110_s4 = smov 15  }
 0x1b3   :  { %1053 = vpow2.f32 %v401_v0  ;;  %984 = vmatpush3.bf16.msk.msra.mxu1 %vm1293_vm11, %v982_v16  ;;  %v1310_v21 = vpack.c.bf16 %v476_v20, %v475_v19 }
 0x1b4   :  { %1055 = vpow2.f32 %v415_v22 }
 0x1b5   :  { %987 = vmatprep.subr.msk.bf16.mxu1 %vm1306_vm12, %v1310_v21 }
 0x1ba   :  { %v1048_v23 = vpop.eup %1047 }
 0x1bb   :  { %v1050_v24 = vpop.eup %1049  ;;  %437 = vrot.lane.b32.xlu0 %v1048_v23, %s1104_s1 }
 0x1bc   :  { %v1052_v25 = vpop.eup %1051  ;;  %435 = vrot.lane.b32.xlu1 %v1050_v24, %s1104_s1 }
 0x1bd   :  { %v1054_v27 = vpop.eup %1053 }
 0x1be   :  { %v1056_v32 = vpop.eup %1055 }
 0x1bf   :  { %445 = vrot.lane.b32.xlu0 %v1052_v25, %s1105_s15 }
 0x1c0   :  { %443 = vrot.lane.b32.xlu1 %v1054_v27, %s1105_s15 }
 0x1c4   :  { %451 = vrot.lane.b32.xlu1 %v1056_v32, %s1106_s16 }
 0x216   :  { %v1259_v34 = vpop.f32.mrb[0].mxu0 }
 0x217   :  { %v200_v37 = vsub.f32 %v1259_v34, %v1172_v30  ;;  %v206_v38 = vsub.f32 %v1259_v34, %v1168_v28  ;;  %v212_v39 = vsub.f32 %v1259_v34, %v1170_v29  ;;  %v942_v40 = vpop.f32.mrb[1].mxu0  ;;  %v218_v42 = vsub.f32 %v1259_v34, %v1174_v31 }
 0x218   :  { %v421_v30 = vsub.f32 %v1217_v5, %v1235_v56  ;;  %v194_v36 = vsub.f32 %v1259_v34, %v1166_v26 }
 0x219   :  { %v201_v43 = vmul.f32 %v1182_v35, %v200_v37  ;;  %v207_v44 = vmul.f32 %v1182_v35, %v206_v38  ;;  %v213_v45 = vmul.f32 %v1182_v35, %v212_v39  ;;  %v219_v28 = vmul.f32 %v1182_v35, %v218_v42 }
 0x21a   :  { %v423_v31 = vmul.f32 %v1249_v63, %v421_v30  ;;  %v195_v37 = vmul.f32 %v1182_v35, %v194_v36  ;;  %v366_v38 = vsub.f32 %v1217_v5, %v1229_v53  ;;  %v367_v39 = vsub.f32 %v1210_v2, %v1229_v53 }
 0x21b   :  { %v202_v29 = vmul.f32 %v201_v43, %v201_v43  ;;  %v208_v47 = vmul.f32 %v207_v44, %v207_v44  ;;  %v214_v48 = vmul.f32 %v213_v45, %v213_v45  ;;  %v220_v58 = vmul.f32 %v219_v28, %v219_v28 }
 0x21c   :  { %v425_v1 = vmul.f32 %v423_v31, %v423_v31  ;;  %v196_v40 = vmul.f32 %v195_v37, %v195_v37  ;;  %v368_v41 = vmul.f32 %v1249_v63, %v366_v38  ;;  %v369_v42 = vmul.f32 %v1249_v63, %v367_v39 }
 0x21d   :  { %v203_v50 = vsub.f32 0.0, %v202_v29  ;;  %v209_v51 = vsub.f32 0.0, %v208_v47  ;;  %v215_v52 = vsub.f32 0.0, %v214_v48  ;;  %v221_v8 = vsub.f32 0.0, %v220_v58 }
 0x21e   :  { %v427_v15 = vsub.f32 0.0, %v425_v1  ;;  %v197_v44 = vsub.f32 0.0, %v196_v40  ;;  %v370_v45 = vmul.f32 %v368_v41, %v368_v41  ;;  %v371_v30 = vmul.f32 %v369_v42, %v369_v42 }
 0x21f   :  { %v204_v59 = vmul.f32 1.442695, %v203_v50  ;;  %v210_v60 = vmul.f32 1.442695, %v209_v51  ;;  %v216_v7 = vmul.f32 1.442695, %v215_v52 }
 0x220   :  { %v222_v14 = vmul.f32 1.442695, %v221_v8  ;;  %v429_v18 = vmul.f32 1.442695, %v427_v15  ;;  %v198_v28 = vmul.f32 1.442695, %v197_v44 }
 0x221   :  { %1057 = vpow2.f32 %v204_v59  ;;  %v372_v34 = vsub.f32 0.0, %v370_v45  ;;  %v373_v35 = vsub.f32 0.0, %v371_v30 }
 0x222   :  { %1059 = vpow2.f32 %v210_v60 }
 0x223   :  { %1061 = vpow2.f32 %v216_v7  ;;  %v374_v29 = vmul.f32 1.442695, %v372_v34  ;;  %v376_v5 = vmul.f32 1.442695, %v373_v35 }
 0x224   :  { %1063 = vpow2.f32 %v417_v10 }
 0x225   :  { %1065 = vpow2.f32 %v222_v14 }
 0x226   :  { %1067 = vpow2.f32 %v431_v3 }
 0x227   :  { %1069 = vpow2.f32 %v429_v18 }
 0x228   :  { %1071 = vpow2.f32 %v198_v28 }
 0x229   :  { %1073 = vpow2.f32 %v374_v29 }
 0x22a   :  { %1075 = vpow2.f32 %v376_v5 }
 0x22b   :  { %v1058_v22 = vpop.eup %1057 }
 0x22c   :  { %v1060_v23 = vpop.eup %1059  ;;  %225 = vrot.lane.b32.xlu1 %v1058_v22, %s1108_s27 }
 0x22d   :  { %229 = vrot.lane.b32.xlu0 %v1060_v23, %s1109_s28  ;;  %v1062_v24 = vpop.eup %1061  ;;  %v438_v26 = vpop.permute.xlu0 %437 }
 0x22e   :  { %v1064_v25 = vpop.eup %1063  ;;  %v436_v43 = vpop.permute.xlu1 %435 }
 0x22f   :  { %v1066_v27 = vpop.eup %1065 }
 0x230   :  { %233 = vrot.lane.b32.xlu1 %v1062_v24, %s1110_s4  ;;  %v1068_v32 = vpop.eup %1067 }
 0x231   :  { %453 = vrot.lane.b32.xlu0 %v1064_v25, %s1106_s16  ;;  %v1070_v33 = vpop.eup %1069  ;;  %v446_v48 = vpop.permute.xlu0 %445 }
 0x232   :  { %v444_v46 = vpop.permute.xlu1 %443  ;;  %v1072_v50 = vpop.eup %1071 }
 0x233   :  { %v1074_v61 = vpop.eup %1073 }
 0x234   :  { %237 = vrot.lane.b32.xlu1 %v1066_v27, %s1111_s29  ;;  %v1076_v1 = vpop.eup %1075  ;;  %v465_v4 = vsel %vm332_vm3, %v1074_v61, %v436_v43  ;;  %v664_v61 = vld [vmem:[%s1437_s5 + $0x18] sm:$0x1] }
 0x235   :  { %461 = vrot.lane.b32.xlu0 %v1068_v32, %s1101_s9  ;;  %v466_v6 = vsel %vm332_vm3, %v1076_v1, %v438_v26  ;;  %v468_v7 = vsel %vm467_vm2, %v465_v4, %v444_v46 }
 0x236   :  { %v452_v47 = vpop.permute.xlu1 %451  ;;  %v469_v9 = vsel %vm467_vm2, %v466_v6, %v446_v48 }
 0x237   :  { %v471_v10 = vsel %vm470_vm5, %v468_v7, %v452_v47 }
 0x238   :  { %459 = vrot.lane.b32.xlu1 %v1070_v33, %s1101_s9 }
 0x29e   :  { %v226_v2 = vpop.permute.xlu1 %225 }
 0x29f   :  { %v230_v49 = vpop.permute.xlu0 %229  ;;  %v241_v51 = vsel %vm240_vm13, %v1072_v50, %v226_v2  ;;  %v661_v50 = vld [vmem:[%s1437_s5] sm:$0xff] }
 0x2a0   :  { %v243_v58 = vsel %vm242_vm14, %v241_v51, %v230_v49  ;;  %v662_v51 = vld [vmem:[%s1437_s5 + $0x8] sm:$0xff] }
 0x2a2   :  { %v234_v31 = vpop.permute.xlu1 %233 }
 0x2a3   :  { %v454_v52 = vpop.permute.xlu0 %453  ;;  %v245_v59 = vsel %vm244_vm15, %v243_v58, %v234_v31  ;;  %v991_v58 = vpack.c.bf16 %v662_v51, %v661_v50 }
 0x2a4   :  { %v472_v12 = vsel %vm470_vm5, %v469_v9, %v454_v52  ;;  %v1113_v9 = vmov 1  }
 0x2a5   :  { %992 = vmatprep.subr.bf16.mxu0 %v991_v58  ;;  %1024 = vset.pattern.permute.xlu0 %v1113_v9 }
 0x2a6   :  { %v238_v60 = vpop.permute.xlu1 %237  ;;  %994 = vmatpush3.bf16.msra.mxu0 %v991_v58 }
 0x2a7   :  { %v247_v62 = vsel %vm246_vm0, %v245_v59, %v238_v60  ;;  %v462_v8 = vpop.permute.xlu0 %461  ;;  %v663_v60 = vld [vmem:[%s1437_s5 + $0x10] sm:$0xff]  ;;  %s1117_s5 = smov 120  }
 0x2a8   :  { %952 = vmatmul.mubr.msk.f32.vlgmr.msra.gmra.mrb[0].mxu1 %vm252_vm1, %v247_v62  ;;  %v474_v14 = vsel %vm107_vm4, %v472_v12, %v462_v8  ;;  %v995_v62 = vpack.c.bf16 %v664_v61, %v663_v60  ;;  %v1112_v8 = vmov 2  }
 0x2a9   :  { %990 = vmatpush3.bf16.msk.msra.mxu1 %vm1306_vm12, %v1310_v21  ;;  %1025 = vset.pattern.permute.xlu1 %v1112_v8 }
 0x2aa   :  { %v460_v11 = vpop.permute.xlu1 %459  ;;  %997 = vmatprep.subr.msk.bf16.mxu0 %vm1293_vm11, %v995_v62 }
 0x2ab   :  { %v473_v13 = vsel %vm107_vm4, %v471_v10, %v460_v11  ;;  %1000 = vmatpush3.bf16.msk.msra.mxu0 %vm1293_vm11, %v995_v62 }
 0x2ac   :  { %958 = vmatprep.mubr.msk.f32.mxu1 %vm242_vm14, %v473_v13 }
 0x2ad   :  { %959 = vmatmul.mubr.msk.f32.vlgmr.msra.gmra.mrb[2].mxu1 %vm242_vm14, %v474_v14 }
 0x37b   :  { %v1345_v15 = vpop.f32.mrb[0].mxu1 }
 0x37c   :  { %v953_v16 = vpop.f32.mrb[1].mxu1 }
 0x380   :  { %v1347_v3 = vpop.f32.mrb[2].mxu1 }
 0x381   :  { %v574_v18 = vsub.f32 %v1347_v3, %v1231_v54  ;;  %v586_v19 = vsub.f32 %v1347_v3, %v1233_v55  ;;  %v598_v20 = vsub.f32 %v1347_v3, %v1237_v57  ;;  %v1355_v0 = vpop.f32.mrb[3].mxu1  ;;  %v610_v25 = vsub.f32 %v1347_v3, %v1235_v56 }
 0x382   :  { %v573_v21 = vsub.f32 %v1355_v0, %v1231_v54  ;;  %v585_v32 = vsub.f32 %v1355_v0, %v1233_v55  ;;  %v597_v45 = vsub.f32 %v1355_v0, %v1237_v57  ;;  %v609_v30 = vsub.f32 %v1355_v0, %v1235_v56 }
 0x383   :  { %v576_v22 = vmul.f32 %v1249_v63, %v574_v18  ;;  %v588_v23 = vmul.f32 %v1249_v63, %v586_v19  ;;  %v600_v24 = vmul.f32 %v1249_v63, %v598_v20  ;;  %v612_v41 = vmul.f32 %v1249_v63, %v610_v25 }
 0x384   :  { %v575_v27 = vmul.f32 %v1249_v63, %v573_v21  ;;  %v587_v38 = vmul.f32 %v1249_v63, %v585_v32  ;;  %v599_v55 = vmul.f32 %v1249_v63, %v597_v45  ;;  %v611_v5 = vmul.f32 %v1249_v63, %v609_v30 }
 0x385   :  { %v578_v33 = vmul.f32 %v576_v22, %v576_v22  ;;  %v590_v36 = vmul.f32 %v588_v23, %v588_v23  ;;  %v602_v40 = vmul.f32 %v600_v24, %v600_v24  ;;  %v614_v26 = vmul.f32 %v612_v41, %v612_v41 }
 0x386   :  { %v577_v37 = vmul.f32 %v575_v27, %v575_v27  ;;  %v589_v44 = vmul.f32 %v587_v38, %v587_v38  ;;  %v601_v29 = vmul.f32 %v599_v55, %v599_v55  ;;  %v613_v49 = vmul.f32 %v611_v5, %v611_v5 }
 0x387   :  { %v580_v54 = vsub.f32 0.0, %v578_v33  ;;  %v592_v39 = vsub.f32 0.0, %v590_v36  ;;  %v604_v46 = vsub.f32 0.0, %v602_v40  ;;  %v616_v48 = vsub.f32 0.0, %v614_v26 }
 0x388   :  { %v579_v43 = vsub.f32 0.0, %v577_v37  ;;  %v591_v35 = vsub.f32 0.0, %v589_v44  ;;  %v603_v57 = vsub.f32 0.0, %v601_v29  ;;  %v615_v52 = vsub.f32 0.0, %v613_v49 }
 0x389   :  { %v583_v42 = vmul.f32 1.442695, %v580_v54  ;;  %v595_v28 = vmul.f32 1.442695, %v592_v39  ;;  %v607_v47 = vmul.f32 1.442695, %v604_v46  ;;  %v561_v17 = vsub.f32 %v1355_v0, %v1229_v53 }
 0x38a   :  { %v581_v34 = vmul.f32 1.442695, %v579_v43  ;;  %v593_v2 = vmul.f32 1.442695, %v591_v35  ;;  %v619_v56 = vmul.f32 1.442695, %v616_v48  ;;  %v562_v14 = vsub.f32 %v1347_v3, %v1229_v53 }
 0x38b   :  { %1077 = vpow2.f32 %v583_v42  ;;  %v605_v31 = vmul.f32 1.442695, %v603_v57  ;;  %v617_v1 = vmul.f32 1.442695, %v615_v52  ;;  %v563_v16 = vmul.f32 %v1249_v63, %v561_v17 }
 0x38c   :  { %1079 = vpow2.f32 %v595_v28  ;;  %v564_v18 = vmul.f32 %v1249_v63, %v562_v14  ;;  %v1114_v55 = vmov 3   ;;  %v1115_v28 = vmov 0  }
 0x38d   :  { %1081 = vpow2.f32 %v581_v34  ;;  %v565_v19 = vmul.f32 %v563_v16, %v563_v16  ;;  %v1116_v46 = vmov 1966171168   ;;  %v753_v34 = vlaneseq }
 0x38e   :  { %1083 = vpow2.f32 %v607_v47  ;;  %v566_v20 = vmul.f32 %v564_v18, %v564_v18  ;;  %v751_v26 = vunpack.c.l.s4 %v1116_v46 }
 0x38f   :  { %1085 = vpow2.f32 %v593_v2  ;;  %v567_v21 = vsub.f32 0.0, %v565_v19  ;;  %v754_v29 = vshrl.u32 %v753_v34, 7 }
 0x390   :  { %1087 = vpow2.f32 %v619_v56  ;;  %v568_v22 = vsub.f32 0.0, %v566_v20  ;;  %v752_v35 = vunpack.c.0.s8 %v751_v26 }
 0x391   :  { %1089 = vpow2.f32 %v605_v31  ;;  %v569_v23 = vmul.f32 1.442695, %v567_v21  ;;  %v784_v57 = vsub.s32 0, %v754_v29 }
 0x392   :  { %1091 = vpow2.f32 %v617_v1  ;;  %v571_v25 = vmul.f32 1.442695, %v568_v22  ;;  %v755_v5 = vsub.s32 %v752_v35, %v754_v29 }
 0x393   :  { %1093 = vpow2.f32 %v569_v23 }
 0x394   :  { %1095 = vpow2.f32 %v571_v25  ;;  %v756_v47 = vrot.slane %v1345_v15, %v755_v5 }
 0x395   :  { %v1078_v59 = vpop.eup %1077 }
 0x396   :  { %625 = vrot.lane.b32.xlu0 %v1078_v59, %s1108_s27  ;;  %v1080_v4 = vpop.eup %1079  ;;  %v757_v48 = vcombine.high %v756_v47, %v756_v47  ;;  %v764_v2 = vrot.slane %v756_v47, %v755_v5 }
 0x397   :  { %v1082_v6 = vpop.eup %1081 }
 0x398   :  { %623 = vrot.lane.b32.xlu1 %v1082_v6, %s1108_s27  ;;  %v1084_v7 = vpop.eup %1083  ;;  %v771_v49 = vrot.slane %v757_v48, %v755_v5  ;;  %v785_v56 = vrot.slane %v764_v2, %v784_v57 }
 0x399   :  { %v1086_v10 = vpop.eup %1085 }
 0x39a   :  { %633 = vrot.lane.b32.xlu0 %v1080_v4, %s1109_s28  ;;  %v1088_v11 = vpop.eup %1087  ;;  %v789_v52 = vrot.slane %v771_v49, %v784_v57 }
 0x39b   :  { %v1090_v12 = vpop.eup %1089 }
 0x39c   :  { %631 = vrot.lane.b32.xlu1 %v1086_v10, %s1109_s28  ;;  %v1092_v13 = vpop.eup %1091 }
 0x39d   :  { %v1094_v37 = vpop.eup %1093 }
 0x39e   :  { %641 = vrot.lane.b32.xlu0 %v1084_v7, %s1110_s4  ;;  %v1096_v53 = vpop.eup %1095 }
 0x3a0   :  { %639 = vrot.lane.b32.xlu1 %v1090_v12, %s1110_s4 }
 0x3a2   :  { %649 = vrot.lane.b32.xlu0 %v1088_v11, %s1111_s29 }
 0x3a4   :  { %647 = vrot.lane.b32.xlu1 %v1092_v13, %s1111_s29 }
 0x408   :  { %v626_v24 = vpop.permute.xlu0 %625 }
 0x409   :  { %v654_v63 = vsel %vm240_vm13, %v1096_v53, %v626_v24 }
 0x40a   :  { %v624_v32 = vpop.permute.xlu1 %623 }
 0x40b   :  { %v653_v3 = vsel %vm240_vm13, %v1094_v37, %v624_v32 }
 0x40c   :  { %v634_v27 = vpop.permute.xlu0 %633 }
 0x40d   :  { %v656_v39 = vsel %vm242_vm14, %v654_v63, %v634_v27 }
 0x40e   :  { %v632_v33 = vpop.permute.xlu1 %631 }
 0x40f   :  { %v655_v38 = vsel %vm242_vm14, %v653_v3, %v632_v33 }
 0x410   :  { %v642_v0 = vpop.permute.xlu0 %641 }
 0x411   :  { %v658_v42 = vsel %vm244_vm15, %v656_v39, %v642_v0 }
 0x412   :  { %v640_v36 = vpop.permute.xlu1 %639 }
 0x413   :  { %v657_v40 = vsel %vm244_vm15, %v655_v38, %v640_v36 }
 0x414   :  { %v650_v54 = vpop.permute.xlu0 %649 }
 0x415   :  { %v660_v44 = vsel %vm246_vm0, %v658_v42, %v650_v54 }
 0x416   :  { %v648_v41 = vpop.permute.xlu1 %647 }
 0x417   :  { %v659_v43 = vsel %vm246_vm0, %v657_v40, %v648_v41 }
 0x418   :  { %969 = vmatprep.mubr.msk.f32.mxu0 %vm252_vm1, %v659_v43 }
 0x419   :  { %970 = vmatmul.mubr.msk.f32.vlgmr.msra.gmra.mrb[2].mxu0 %vm252_vm1, %v660_v44 }
 0x4ec   :  { %v971_v45 = vpop.f32.mrb[2].mxu0 }
 0x4ed   :  { %833 = vperm.xlu1 %1025, %v971_v45   ;;  %801 = vperm.xlu0 %1024, %v971_v45   ;;  %v740_v30 = vpop.f32.mrb[3].mxu0 }
 0x4f1   :  { %1026 = vset.pattern.permute.xlu1 %v1113_v9  ;;  %1028 = vset.pattern.permute.xlu0 %v1114_v55 }
 0x4f2   :  { %861 = vperm.xlu0 %1028, %v740_v30   ;;  %797 = vperm.xlu1 %1026, %v740_v30  }
 0x4f6   :  { %1030 = vset.pattern.permute.xlu0 %v1115_v28  ;;  %1027 = vset.pattern.permute.xlu1 %v1112_v8 }
 0x4f7   :  { %779 = vperm.xlu0 %1030, %v971_v45   ;;  %829 = vperm.xlu1 %1027, %v740_v30  }
 0x4fb   :  { %1029 = vset.pattern.permute.xlu1 %v1114_v55  ;;  %1032 = vset.pattern.permute.xlu0 %v1114_v55 }
 0x4fc   :  { %865 = vperm.xlu1 %1029, %v971_v45  }
 0x500   :  { %1031 = vset.pattern.permute.xlu1 %v1115_v28 }
 0x501   :  { %774 = vperm.xlu1 %1031, %v740_v30  }
 0x56c   :  { %v834_v50 = vpop.permute.xlu1 %833  ;;  %v802_v51 = vpop.permute.xlu0 %801 }
 0x56d   :  { %v805_v31 = vmul.f32 %v802_v51, %v785_v56  ;;  %v807_v58 = vmul.f32 %v802_v51, %v789_v52  ;;  %v837_v61 = vmul.f32 %v834_v50, %v785_v56  ;;  %v839_v15 = vmul.f32 %v834_v50, %v789_v52 }
 0x56f   :  { %814 = vrot.lane.b32.xlu1 %v805_v31, %s1117_s5 }
 0x571   :  { %v798_v59 = vpop.permute.xlu1 %797  ;;  %v862_v7 = vpop.permute.xlu0 %861 }
 0x572   :  { %v806_v60 = vmul.f32 %v798_v59, %v789_v52  ;;  %v868_v9 = vmul.f32 %v862_v7, %v785_v56  ;;  %v804_v10 = vmul.f32 %v798_v59, %v785_v56  ;;  %v870_v11 = vmul.f32 %v862_v7, %v789_v52 }
 0x573   :  { %818 = vrot.lane.b32.xlu1 %v807_v58, %s1117_s5 }
 0x574   :  { %816 = vrot.lane.b32.xlu0 %v806_v60, %s1117_s5 }
 0x576   :  { %v830_v62 = vpop.permute.xlu1 %829  ;;  %v780_v14 = vpop.permute.xlu0 %779 }
 0x577   :  { %v836_v1 = vmul.f32 %v830_v62, %v785_v56  ;;  %846 = vrot.lane.b32.xlu1 %v837_v61, %s1118_s13  ;;  %v838_v4 = vmul.f32 %v830_v62, %v789_v52  ;;  %v793_v21 = vmul.f32 %v785_v56, %v780_v14  ;;  %v795_v36 = vmul.f32 %v789_v52, %v780_v14 }
 0x579   :  { %844 = vrot.lane.b32.xlu0 %v836_v1, %s1118_s13 }
 0x57b   :  { %850 = vrot.lane.b32.xlu1 %v839_v15, %s1118_s13  ;;  %v866_v6 = vpop.permute.xlu1 %865 }
 0x57c   :  { %v869_v8 = vmul.f32 %v866_v6, %v785_v56  ;;  %v871_v12 = vmul.f32 %v866_v6, %v789_v52 }
 0x57d   :  { %848 = vrot.lane.b32.xlu0 %v838_v4, %s1118_s13 }
 0x57f   :  { %878 = vrot.lane.b32.xlu1 %v869_v8, %s1119_s14 }
 0x580   :  { %v775_v13 = vpop.permute.xlu1 %774 }
 0x581   :  { %876 = vrot.lane.b32.xlu0 %v868_v9, %s1119_s14  ;;  %v794_v32 = vmul.f32 %v789_v52, %v775_v13  ;;  %v792_v37 = vmul.f32 %v785_v56, %v775_v13 }
 0x583   :  { %812 = vrot.lane.b32.xlu1 %v804_v10, %s1117_s5 }
 0x585   :  { %880 = vrot.lane.b32.xlu0 %v870_v11, %s1119_s14 }
 0x587   :  { %882 = vrot.lane.b32.xlu1 %v871_v12, %s1119_s14 }
 0x5e1   :  { %v815_v17 = vpop.permute.xlu1 %814 }
 0x5e2   :  { %v825_v23 = vadd.f32 %v815_v17, %v793_v21 }
 0x5e5   :  { %v819_v16 = vpop.permute.xlu1 %818 }
 0x5e6   :  { %v817_v18 = vpop.permute.xlu0 %816  ;;  %v827_v63 = vadd.f32 %v819_v16, %v795_v36 }
 0x5e7   :  { %v826_v53 = vadd.f32 %v817_v18, %v794_v32 }
 0x5e9   :  { %v847_v19 = vpop.permute.xlu1 %846 }
 0x5ea   :  { %v857_v25 = vadd.f32 %v847_v19, %v825_v23 }
 0x5eb   :  { %v845_v20 = vpop.permute.xlu0 %844 }
 0x5ed   :  { %v851_v22 = vpop.permute.xlu1 %850 }
 0x5ee   :  { %v859_v40 = vadd.f32 %v851_v22, %v827_v63 }
 0x5ef   :  { %v849_v24 = vpop.permute.xlu0 %848 }
 0x5f0   :  { %v858_v38 = vadd.f32 %v849_v24, %v826_v53 }
 0x5f1   :  { %v879_v27 = vpop.permute.xlu1 %878 }
 0x5f2   :  { %v889_v33 = vadd.f32 %v879_v27, %v857_v25 }
 0x5f3   :  { %v877_v0 = vpop.permute.xlu0 %876 }
 0x5f4   :  { %893 = vst.msk [vmem:[%s1438_s6 + $0x8] sm:$0xff] %vm107_vm4, %v889_v33 }
 0x5f5   :  { %v813_v3 = vpop.permute.xlu1 %812 }
 0x5f6   :  { %v824_v54 = vadd.f32 %v813_v3, %v792_v37 }
 0x5f7   :  { %v881_v39 = vpop.permute.xlu0 %880 }
 0x5f8   :  { %v856_v41 = vadd.f32 %v845_v20, %v824_v54  ;;  %v890_v42 = vadd.f32 %v881_v39, %v858_v38 }
 0x5f9   :  { %v883_v43 = vpop.permute.xlu1 %882 }
 0x5fa   :  { %v888_v44 = vadd.f32 %v877_v0, %v856_v41  ;;  %894 = vst.msk [vmem:[%s1438_s6 + $0x10] sm:$0xff] %vm107_vm4, %v890_v42  ;;  %v891_v45 = vadd.f32 %v883_v43, %v859_v40 }
 0x5fc   :  { %892 = vst.msk [vmem:[%s1438_s6] sm:$0xff] %vm107_vm4, %v888_v44  ;;  %895 = vst.msk [vmem:[%s1438_s6 + $0x18] sm:$0xff] %vm107_vm4, %v891_v45 }

</bundles_post_ra>
